<compile_context>
chip_gen: v5e
topology: v5e:2x2
jax: 0.10.0
libtpu: 0.0.40
codegen_flags: <defaults>
</compile_context>

<pallas_src>
import functools

import jax
import jax.numpy as jnp
from jax.experimental import pallas as pl
from jax.experimental.pallas import tpu as pltpu


_LANE = 128          # pad feature / class dims to lane width
_SUBLANE = 8         # pad batch to sublane width
_BATCH_TILE = 1024   # target batch tile for the gridded large-batch path
_SMALL_BATCH_MAX = 512  # <= this: single whole-array VMEM block, no grid


def _round_up(x, m):
    return (x + m - 1) // m * m


# ----------------------------- kernels --------------------------------------


def _fc_kernel(x_ref, w1_ref, b1_ref, w2_ref, b2_ref, o_ref):
    # Linear -> ReLU -> Linear.  x and weights are bf16 (MXU-native), biases
    # and accumulation are f32.  Weights are pre-transposed to (in, out).
    x = x_ref[...]
    h = jnp.dot(x, w1_ref[...], preferred_element_type=jnp.float32) + b1_ref[...]
    h = jnp.maximum(h, 0.0).astype(jnp.bfloat16)
    o = jnp.dot(h, w2_ref[...], preferred_element_type=jnp.float32) + b2_ref[...]
    o_ref[...] = o.astype(o_ref.dtype)


def _fc_sig_kernel(x_ref, w1_ref, b1_ref, w2_ref, b2_ref, o_ref):
    # Two stacked Linear layers (the reference 'fc_sig' applies no sigmoid).
    x = x_ref[...]
    h = jnp.dot(x, w1_ref[...], preferred_element_type=jnp.float32) + b1_ref[...]
    o = jnp.dot(h.astype(jnp.bfloat16), w2_ref[...],
                preferred_element_type=jnp.float32) + b2_ref[...]
    o_ref[...] = o.astype(o_ref.dtype)


def _fc_softmax_kernel(x_ref, w_ref, b_ref, o_ref):
    # Linear -> Softmax(dim=1).  Padded class columns carry a -1e30 bias baked
    # into b_ref at init (padded weight columns are zero), so their logits are
    # exactly -1e30 and exp() contributes 0 -- no per-iteration mask needed.
    logits = jnp.dot(x_ref[...], w_ref[...],
                     preferred_element_type=jnp.float32) + b_ref[...]
    m = jnp.max(logits, axis=1, keepdims=True)
    e = jnp.exp(logits - m)
    denom = jnp.sum(e, axis=1, keepdims=True)
    o_ref[...] = (e * pl.reciprocal(denom, approx=True)).astype(o_ref.dtype)


# ----------------------------- wrapper ---------------------------------------


class ReadoutFunctionPallas:
    """JAX/Pallas reimplementation of ReadoutFunction's forward pass."""

    def __init__(self, readout_def, args, key=None):
        self.r_definition = readout_def.lower()
        self.args = args
        if self.r_definition not in ("fc", "fc_soft_max", "fc_sig"):
            raise ValueError(
                f"Incorrect definition for readout function: {readout_def}"
            )
        key = key if key is not None else jax.random.PRNGKey(0)

        F = int(args["readout_input_size"])
        C = int(args["output_classes"])
        self._F, self._C = F, C
        self._FP = _round_up(F, _LANE)
        self._CP = _round_up(C, _LANE)

        def linear_init(k, in_f, out_f):
            # nn.Linear-style U(-1/sqrt(fan_in), 1/sqrt(fan_in)) init, returned
            # already transposed to (in, out) so the kernel never transposes.
            kw, kb = jax.random.split(k)
            bound = 1.0 / jnp.sqrt(jnp.float32(in_f))
            wt = jax.random.uniform(kw, (in_f, out_f), jnp.float32, -bound, bound)
            b = jax.random.uniform(kb, (1, out_f), jnp.float32, -bound, bound)
            return wt, b

        def pack_weight(wt, in_pad, out_pad):
            # Store bf16 (halves HBM->VMEM bytes / VMEM residency), zero-pad to
            # lane multiples.  Keep an f32 unpadded copy of the *quantized*
            # weights for the pure-JAX reference used in the self-test.
            wt_q = wt.astype(jnp.bfloat16)
            wt_p = (
                jnp.zeros((in_pad, out_pad), jnp.bfloat16)
                .at[: wt.shape[0], : wt.shape[1]]
                .set(wt_q)
            )
            return wt_p, wt_q.astype(jnp.float32)

        def pack_bias(b, out_pad, pad_fill=0.0):
            # Biases stay f32 (tiny); pad_fill=-1e30 bakes the softmax class
            # mask into the padded columns.
            b_p = (
                jnp.full((1, out_pad), jnp.float32(pad_fill))
                .at[:, : b.shape[1]]
                .set(b)
            )
            return b_p, b

        if self.r_definition in ("fc", "fc_sig"):
            k1, k2 = jax.random.split(key)
            w1t, b1 = linear_init(k1, F, F)
            w2t, b2 = linear_init(k2, F, C)
            self.w1, self.w1_ref = pack_weight(w1t, self._FP, self._FP)
            self.b1, self.b1_ref = pack_bias(b1, self._FP)
            self.w2, self.w2_ref = pack_weight(w2t, self._FP, self._CP)
            self.b2, self.b2_ref = pack_bias(b2, self._CP)
        else:  # fc_soft_max
            w1t, b1 = linear_init(key, F, C)
            self.w1, self.w1_ref = pack_weight(w1t, self._FP, self._CP)
            self.b1, self.b1_ref = pack_bias(b1, self._CP, pad_fill=-1e30)
            self.w2 = self.b2 = self.w2_ref = self.b2_ref = None

    def get_definition(self):
        return self.r_definition

    def get_args(self):
        return self.args

    # --------------------------------------------------------------------- #

    @functools.partial(jax.jit, static_argnums=0)
    def __call__(self, h_v):
        B, F = h_v.shape
        if F != self._F:
            raise ValueError(f"expected feature dim {self._F}, got {F}")
        FP, C = self._FP, self._C

        if B <= _SMALL_BATCH_MAX:
            tile_b = None
            Bp = _round_up(max(B, _SUBLANE), _SUBLANE)
        else:
            # >= 2 grid steps so "parallel" spans v7x's 2 TensorCores; batch
            # padding waste is bounded by 7 rows per tile.
            n_tiles = max(2, pl.cdiv(B, _BATCH_TILE))
            tile_b = _round_up(pl.cdiv(B, n_tiles), _SUBLANE)
            Bp = n_tiles * tile_b

        x = h_v
        if (Bp, FP) != (B, F):
            x = jnp.pad(x, ((0, Bp - B), (0, FP - F)))
        # bf16 activations for the MXU-native bf16 x bf16 path; this cast fuses
        # with the pad above (single HBM pass) under jit.
        x = x.astype(jnp.bfloat16)

        out = self._readout_padded(x, h_v.dtype, tile_b)
        if out.shape != (B, C):
            out = out[:B, :C]
        return out

    def _readout_padded(self, x, out_dtype, tile_b):
        Bp, FP = x.shape
        CP = self._CP
        out_shape = jax.ShapeDtypeStruct((Bp, CP), out_dtype)

        if self.r_definition == "fc_soft_max":
            kernel = _fc_softmax_kernel
            operands = (x, self.w1, self.b1)
        else:
            kernel = _fc_kernel if self.r_definition == "fc" else _fc_sig_kernel
            operands = (x, self.w1, self.b1, self.w2, self.b2)

        if tile_b is None:
            # Single whole-array VMEM block: no grid, no software-pipeline
            # prologue/epilogue, no double-buffering of the weights.
            vmem = pl.BlockSpec(memory_space=pltpu.MemorySpace.VMEM)
            return pl.pallas_call(
                kernel,
                out_shape=out_shape,
                in_specs=[vmem] * len(operands),
                out_specs=vmem,
            )(*operands)

        # Large batch: tile rows; weights/biases have a constant block index so
        # they stay resident, single-buffered (double-buffering a constant
        # block only wastes VMEM -- critical on v7x 64 MiB / v5e 16 MiB scoped).
        grid = (Bp // tile_b,)
        single = pl.Buffered(1)
        in_specs = [pl.BlockSpec((tile_b, FP), lambda i: (i, 0))]
        in_specs += [
            pl.BlockSpec(op.shape, lambda i: (0, 0), pipeline_mode=single)
            for op in operands[1:]
        ]
        out_spec = pl.BlockSpec((tile_b, CP), lambda i: (i, 0))

        # Rough VMEM budget: double-buffered bf16 x tile + f32 out tile,
        # single-buffered weights/biases, f32 intermediate; 2x headroom.
        est = (
            2 * tile_b * FP * 2
            + 2 * tile_b * CP * 4
            + sum(int(op.size) * op.dtype.itemsize for op in operands[1:])
            + tile_b * FP * 4
        )
        vmem_limit = int(min(max(2 * est, 32 * 1024 * 1024), 64 * 1024 * 1024))

        return pl.pallas_call(
            kernel,
            out_shape=out_shape,
            grid=grid,
            in_specs=in_specs,
            out_specs=out_spec,
            compiler_params=pltpu.CompilerParams(
                dimension_semantics=("parallel",),
                vmem_limit_bytes=vmem_limit,
            ),
        )(*operands)


# ----------------------------- reference (plain JAX) --------------------------


def _reference(readout, h_v):
    # Uses the same bf16-quantized weights (in f32) as the kernel; activations
    # stay f32 here, so the comparison tolerance covers the bf16 act rounding.
    x = h_v.astype(jnp.float32)
    if readout.r_definition == "fc":
        h = jnp.maximum(x @ readout.w1_ref + readout.b1_ref, 0.0)
        return h @ readout.w2_ref + readout.b2_ref
    if readout.r_definition == "fc_sig":
        h = x @ readout.w1_ref + readout.b1_ref
        return h @ readout.w2_ref + readout.b2_ref
    logits = x @ readout.w1_ref + readout.b1_ref
    return jax.nn.softmax(logits, axis=1)


# ----------------------------- main -------------------------------------------


if __name__ == "__main__":
    key = jax.random.PRNGKey(0)
    k_in, k_fc, k_sm, k_sig = jax.random.split(key, 4)

    batch = 8
    readout_input_size = 32
    output_classes = 8
    args = {
        "readout_input_size": readout_input_size,
        "output_classes": output_classes,
    }

    h_v = jax.random.normal(k_in, (batch, readout_input_size), jnp.float32)

    ok = True
    cases = (
        ("fc", k_fc, 1e-2),          # bf16 activations/weights -> ~1e-2 parity
        ("fc_soft_max", k_sm, 1e-2),  # approx reciprocal + bf16
        ("fc_sig", k_sig, 1e-2),
    )
    for name, k, tol in cases:
        readout = ReadoutFunctionPallas(name, args, key=k)
        out = jax.block_until_ready(readout(h_v))
        ref = _reference(readout, h_v)
        if out.shape != (batch, output_classes):
            ok = False
        if not jnp.allclose(out, ref, atol=tol, rtol=tol):
            ok = False

    if ok:
        print("KERNEL_OK")
</pallas_src>

<mosaic_0001>
module attributes {stable_mosaic.version = 11 : i64} {
  func.func @_fc_kernel(%arg0: memref<8x128xbf16, #tpu.memory_space<vmem>>, %arg1: memref<128x128xbf16, #tpu.memory_space<vmem>>, %arg2: memref<1x128xf32, #tpu.memory_space<vmem>>, %arg3: memref<128x128xbf16, #tpu.memory_space<vmem>>, %arg4: memref<1x128xf32, #tpu.memory_space<vmem>>, %arg5: memref<8x128xf32, #tpu.memory_space<vmem>>) attributes {dimension_semantics = [], scalar_prefetch = 0 : i64, scratch_operands = 0 : i64, tpu.core_type = #tpu.core_type<tc>} {
    %c0 = arith.constant 0 : index
    %c0_0 = arith.constant 0 : index
    %0 = vector.load %arg0[%c0, %c0_0] : memref<8x128xbf16, #tpu.memory_space<vmem>>, vector<8x128xbf16>
    %c0_1 = arith.constant 0 : index
    %c0_2 = arith.constant 0 : index
    %1 = vector.load %arg1[%c0_1, %c0_2] : memref<128x128xbf16, #tpu.memory_space<vmem>>, vector<128x128xbf16>
    %cst = arith.constant dense<0.000000e+00> : vector<8x128xf32>
    %2 = tpu.matmul %0, %1, %cst {dimension_numbers = #tpu.dot_dimension_numbers<[1], [0], [0], [1], [0, 0, 1, 1], [], []>} : vector<8x128xbf16>, vector<128x128xbf16>, vector<8x128xf32> -> vector<8x128xf32>
    %c0_3 = arith.constant 0 : index
    %c0_4 = arith.constant 0 : index
    %3 = vector.load %arg2[%c0_3, %c0_4] : memref<1x128xf32, #tpu.memory_space<vmem>>, vector<1x128xf32>
    %4 = vector.broadcast %3 : vector<1x128xf32> to vector<8x128xf32>
    %5 = arith.addf %2, %4 : vector<8x128xf32>
    %cst_5 = arith.constant 0.000000e+00 : f32
    %6 = vector.broadcast %cst_5 : f32 to vector<8x128xf32>
    %7 = arith.maximumf %5, %6 : vector<8x128xf32>
    %8 = arith.truncf %7 : vector<8x128xf32> to vector<8x128xbf16>
    %c0_6 = arith.constant 0 : index
    %c0_7 = arith.constant 0 : index
    %9 = vector.load %arg3[%c0_6, %c0_7] : memref<128x128xbf16, #tpu.memory_space<vmem>>, vector<128x128xbf16>
    %cst_8 = arith.constant dense<0.000000e+00> : vector<8x128xf32>
    %10 = tpu.matmul %8, %9, %cst_8 {dimension_numbers = #tpu.dot_dimension_numbers<[1], [0], [0], [1], [0, 0, 1, 1], [], []>} : vector<8x128xbf16>, vector<128x128xbf16>, vector<8x128xf32> -> vector<8x128xf32>
    %c0_9 = arith.constant 0 : index
    %c0_10 = arith.constant 0 : index
    %11 = vector.load %arg4[%c0_9, %c0_10] : memref<1x128xf32, #tpu.memory_space<vmem>>, vector<1x128xf32>
    %12 = vector.broadcast %11 : vector<1x128xf32> to vector<8x128xf32>
    %13 = arith.addf %10, %12 : vector<8x128xf32>
    %c0_11 = arith.constant 0 : index
    %c0_12 = arith.constant 0 : index
    %14 = vector.load %arg5[%c0_11, %c0_12] : memref<8x128xf32, #tpu.memory_space<vmem>>, vector<8x128xf32>
    tpu.vector_store %arg5[%c0_11, %c0_12], %13 {strides = array<i32>} : memref<8x128xf32, #tpu.memory_space<vmem>>, vector<8x128xf32>,
    return
  }
}

</mosaic_0001>

<bundles_post_ra>
// kernel: a_call__.1
= control target key start
LH: loop header
LB: loop body
LE: loop exit
PB: predicated region body
PF: predicated region fallthrough
CT: control target
= control target key end

     0   :  { %10 = vsyncpa [#allocation3], 0  ;;  %s455_s0 = inlined_call_operand.vmem [shape: bf16[8,128], index: 0, kind: input, shape index: {}]   ;;  %s456_s1 = inlined_call_operand.hbm [shape: bf16[128,128], index: 1, kind: input, shape index: {}]   ;;  %s457_s2 = inlined_call_operand.vmem [shape: f32[1,128], index: 2, kind: input, shape index: {}]   ;;  %s458_s3 = inlined_call_operand.hbm [shape: bf16[128,128], index: 3, kind: input, shape index: {}]   ;;  %s459_s4 = inlined_call_operand.vmem [shape: f32[1,128], index: 4, kind: input, shape index: {}]   ;;  %s460_s5 = inlined_call_operand.hbm [shape: f32[8,128], index: 5, kind: output, shape index: {}]  }
   0x1   :  { %11 = vsyncpa [#allocation6], 0 }
   0x2   :  { %12 = vsyncpa [#allocation4], 0  ;;  %s19_s20 = sshll.u32 %s456_s1, 4  ;;  %s402_s21 = smov [#allocation2]   ;;  %s20_s20 = int_to_ptr.hbm [resolvable:$true] %s19_s20 }
   0x3   :  { %s21_s22 = sshll.u32 %s402_s21, 4  ;;  %s34_s25 = sshll.u32 %s458_s3, 4  ;;  %s22_s22 = int_to_ptr.vmem [resolvable:$true] %s21_s22  ;;  %s35_s25 = int_to_ptr.hbm [resolvable:$true] %s34_s25 }
   0x4   :  { %s403_s26 = smov 64   ;;  %s404_s27 = smov 4  }
   0x5   :  { %27 = dma.hbm_to_vmem [thread:$0]  %s20_s20, 1024, %s22_s22, [#allocation3], %s403_s26, %s403_s26, %s404_s27  }
   0x6   :  { %s405_s28 = smov [#allocation5]  }
   0x7   :  { %s36_s29 = sshll.u32 %s405_s28, 4  ;;  %s37_s29 = int_to_ptr.vmem [resolvable:$true] %s36_s29 }
   0x8   :  { %42 = dma.hbm_to_vmem [thread:$0]  %s35_s25, 1024, %s37_s29, [#allocation6], %s403_s26, %s403_s26, %s404_s27  }
   0x9   :  { %396 = dma.done.wait [#allocation3], 1024  }
   0xa   :  { %397 = vsyncadd [#allocation3], 4294966272 }
   0xb   :  { %398 = dma.done.wait [#allocation6], 1024  }
   0xc   :  { %399 = vsyncadd [#allocation6], 4294966272  ;;  %v308_v0 = vld [vmem:[#allocation2 + $0x38] sm:$0xff]  ;;  %v307_v1 = vld [vmem:[#allocation2 + $0x30] sm:$0xff]  ;;  %s226_s12 = sshll.u32 %s460_s5, 4  ;;  %s227_s12 = int_to_ptr.hbm [resolvable:$true] %s226_s12 }
   0xd   :  { %122 = vmatpush.bf16.msra.mxu0 %v308_v0  ;;  %v316_v2 = vld [vmem:[#allocation5 + $0x38] sm:$0xff]  ;;  %v315_v3 = vld [vmem:[#allocation5 + $0x30] sm:$0xff]  ;;  %v306_v4 = vld [vmem:[#allocation2 + $0x28] sm:$0xff] }
   0xe   :  { %205 = vmatpush.bf16.msra.mxu1 %v316_v2  ;;  %v314_v5 = vld [vmem:[#allocation5 + $0x28] sm:$0xff]  ;;  %v305_v6 = vld [vmem:[#allocation2 + $0x20] sm:$0xff]  ;;  %v304_v8 = vld [vmem:[#allocation2 + $0x18] sm:$0xff] }
   0xf   :  { %v313_v7 = vld [vmem:[#allocation5 + $0x20] sm:$0xff]  ;;  %v312_v9 = vld [vmem:[#allocation5 + $0x18] sm:$0xff]  ;;  %v303_v10 = vld [vmem:[#allocation2 + $0x10] sm:$0xff] }
  0x10   :  { %v311_v11 = vld [vmem:[#allocation5 + $0x10] sm:$0xff]  ;;  %v302_v12 = vld [vmem:[#allocation2 + $0x8] sm:$0xff]  ;;  %v301_v13 = vld [vmem:[#allocation2] sm:$0xff] }
  0x11   :  { %123 = vmatpush.bf16.msra.mxu0 %v307_v1  ;;  %v53_v14 = vld [vmem:[%s455_s0] sm:$0xf]  ;;  %v310_v15 = vld [vmem:[#allocation5 + $0x8] sm:$0xff]  ;;  %s406_s0 = smov [#allocation7]  }
  0x12   :  { %206 = vmatpush.bf16.msra.mxu1 %v315_v3  ;;  %v309_v16 = vld [vmem:[#allocation5] sm:$0xff]  ;;  %s224_s9 = sshll.u32 %s406_s0, 4  ;;  %s225_s9 = int_to_ptr.vmem [resolvable:$true] %s224_s9 }
  0x13   :  { %v322_v17 = vld [vmem:[%s457_s2] ss:$0 sm:$0xff] }
  0x14   :  { %v323_v23 = vld [vmem:[%s459_s4] ss:$0 sm:$0xff] }
  0x15   :  { %124 = vmatpush.bf16.msra.mxu0 %v306_v4 }
  0x16   :  { %207 = vmatpush.bf16.msra.mxu1 %v314_v5 }
  0x19   :  { %125 = vmatpush.bf16.msra.mxu0 %v305_v6 }
  0x1a   :  { %208 = vmatpush.bf16.msra.mxu1 %v313_v7 }
  0x1d   :  { %126 = vmatpush.bf16.msra.mxu0 %v304_v8 }
  0x1e   :  { %209 = vmatpush.bf16.msra.mxu1 %v312_v9 }
  0x21   :  { %127 = vmatpush.bf16.msra.mxu0 %v303_v10 }
  0x22   :  { %210 = vmatpush.bf16.msra.mxu1 %v311_v11 }
  0x25   :  { %128 = vmatpush.bf16.msra.mxu0 %v302_v12 }
  0x26   :  { %211 = vmatpush.bf16.msra.mxu1 %v310_v15 }
  0x29   :  { %129 = vmatpush.bf16.msra.mxu0 %v301_v13 }
  0x2a   :  { %212 = vmatpush.bf16.msra.mxu1 %v309_v16 }
  0x2c   :  { %130 = vmatmul.bf16.vlgmr.msra.gmra.mxu0 %v53_v14 }
  0xa9   :  { %v131_v18 = vpop.f32.mrf.mxu0 }
  0xaa   :  { %v132_v19 = vadd.f32 %v322_v17, %v131_v18 }
  0xac   :  { %v135_v20 = vmax.f32 %v132_v19, 0.0 }
  0xae   :  { %v136_v21 = vpack.c.bf16 %v135_v20, %v135_v20 }
  0xb0   :  { %213 = vmatmul.bf16.vlgmr.msra.gmra.mxu1 %v136_v21 }
  0xb1   :  { %v133_v22 = vpop.f32.mrf.mxu0 }
 0x12d   :  { %v214_v24 = vpop.f32.mrf.mxu1 }
 0x12e   :  { %v215_v25 = vadd.f32 %v323_v23, %v214_v24 }
 0x130   :  { %218 = vst [vmem:[#allocation7] sm:$0xff] %v215_v25 }
 0x131   :  { %229 = dma.vmem_to_hbm [thread:$0]  %s225_s9, 128, %s227_s12, [#allocation4]  }
 0x135   :  { %v216_v26 = vpop.f32.mrf.mxu1 }
 0x136   :  { %400 = dma.done.wait [#allocation4], 128  }
 0x137   :  { %401 = vsyncadd [#allocation4], 4294967168 }
 0x138   :  { %234 = vsyncpa [#allocation3], 1 }
 0x139   :  { %235 = vsyncpa [#allocation6], 1 }
 0x13a   :  { %236 = vsyncpa [#allocation4], 1 }

</bundles_post_ra>
